<compile_context>
chip_gen: v6e
topology: v6e:2x2x1
jax: 0.10.0
libtpu: 0.0.40
codegen_flags: <defaults>
</compile_context>

<pallas_src>
import functools

import jax
import jax.numpy as jnp
from jax.experimental import pallas as pl
from jax.experimental.pallas import tpu as pltpu

LN_EPS = 1e-5      # PyTorch nn.LayerNorm default
PACK_W = 128       # lane width of the packed small-parameter tile


def _round_up(x, m):
    return (x + m - 1) // m * m


def _layernorm(x, gamma, beta, dim):
    # Single-pass LN: sum(x) and sum(x*x) are independent -> overlap on XLUs.
    s = jnp.sum(x, axis=-1, keepdims=True)
    s2 = jnp.sum(x * x, axis=-1, keepdims=True)
    inv_d = 1.0 / float(dim)
    mean = s * inv_d
    var = jnp.maximum(s2 * inv_d - mean * mean, 0.0)
    x_hat = (x - mean) * jax.lax.rsqrt(var + LN_EPS)
    return x_hat * gamma + beta


def comm_encoder_kernel(x_ref, w1_ref, w2_ref, w3_ref, p_ref, o_ref, *,
                        hidden, latent_dim):
    x = x_ref[...]                    # (block_b, input_dim) bf16
    p = p_ref[...]                    # (8, PACK_W) f32 packed small params

    b1, g1, be1 = p[0:1, :hidden], p[1:2, :hidden], p[2:3, :hidden]
    b2, g2, be2 = p[3:4, :hidden], p[4:5, :hidden], p[5:6, :hidden]
    b3 = p[6:7, :latent_dim]

    # Block 1: Linear -> ReLU -> LayerNorm (bf16 MXU operands, f32 accumulate)
    h = jnp.dot(x, w1_ref[...], preferred_element_type=jnp.float32) + b1
    h = jnp.maximum(h, 0.0)
    h = _layernorm(h, g1, be1, hidden)

    # Block 2: Linear -> ReLU -> LayerNorm
    h = jnp.dot(h.astype(jnp.bfloat16), w2_ref[...],
                preferred_element_type=jnp.float32) + b2
    h = jnp.maximum(h, 0.0)
    h = _layernorm(h, g2, be2, hidden)

    # Head: Linear -> Tanh, stored at the true latent width (no lane padding)
    z = jnp.dot(h.astype(jnp.bfloat16), w3_ref[...],
                preferred_element_type=jnp.float32) + b3
    o_ref[...] = jnp.tanh(z).astype(o_ref.dtype)


def prepare_params(params):
    """One-time prep: bf16 matmul weights + one packed (8, PACK_W) f32 tile.

    Call once and reuse across forward passes (keeps the tiny concat/pad ops
    out of the per-call path of a microsecond-scale kernel).
    """
    hidden = params["w1"].shape[1]
    latent_dim = params["w3"].shape[1]
    assert hidden <= PACK_W and latent_dim <= PACK_W

    def _row(v):
        r = jnp.asarray(v, jnp.float32).reshape(1, -1)
        return jnp.pad(r, ((0, 0), (0, PACK_W - r.shape[1])))

    packed = jnp.concatenate(
        [_row(params["b1"]), _row(params["g1"]), _row(params["be1"]),
         _row(params["b2"]), _row(params["g2"]), _row(params["be2"]),
         _row(params["b3"]), jnp.zeros((1, PACK_W), jnp.float32)],
        axis=0)                                           # (8, PACK_W)

    return {
        "w1": jnp.asarray(params["w1"], jnp.bfloat16),
        "w2": jnp.asarray(params["w2"], jnp.bfloat16),
        "w3": jnp.asarray(params["w3"], jnp.bfloat16),
        "packed": packed,
    }


def _auto_block_b(B, input_dim, latent_dim):
    if B <= 8:
        return B                      # block == full batch dim (always legal)
    bytes_per_row = 2 * input_dim + 4 * latent_dim        # bf16 x tile, f32 out tile
    vmem_rows = (8 << 20) // max(bytes_per_row, 1)        # keep x/out pair << scoped VMEM
    cap = max(8, min(4096, (vmem_rows // 8) * 8))
    steps = pl.cdiv(B, cap)
    if steps == 1 and B >= 16:
        steps = 2                     # give both v7x TensorCores a full tile
    elif steps > 1 and steps % 2:
        steps += 1                    # even step count -> no TC load imbalance
    return max(8, _round_up(pl.cdiv(B, steps), 8))


@functools.partial(jax.jit, static_argnames=("block_b",))
def communication_encoder(state, prepared, *, block_b=None):
    """Fused forward pass.  state: [B, input_dim] float32 -> [B, latent_dim]."""
    B, input_dim = state.shape
    hidden = prepared["w1"].shape[1]
    latent_dim = prepared["w3"].shape[1]

    if block_b is None:
        block_b = _auto_block_b(B, input_dim, latent_dim)
    assert block_b == B or (block_b % 8 == 0 and block_b > 0)

    # Ragged last block is handled by Pallas (masked output writeback); all
    # in-kernel math is row-wise, so garbage rows in the last tile are harmless.
    grid = (pl.cdiv(B, block_b),)

    # bf16 input stream: halves the dominant HBM read and uses the MXU's
    # native bf16 path (portable to v5e — only the MXU sees bf16 there).
    x = state.astype(jnp.bfloat16)

    out = pl.pallas_call(
        functools.partial(comm_encoder_kernel, hidden=hidden,
                          latent_dim=latent_dim),
        out_shape=jax.ShapeDtypeStruct((B, latent_dim), state.dtype),
        grid_spec=pltpu.PrefetchScalarGridSpec(
            num_scalar_prefetch=0,
            grid=grid,
            in_specs=[
                pl.BlockSpec((block_b, input_dim), lambda i: (i, 0)),   # x tile
                pl.BlockSpec((input_dim, hidden), lambda i: (0, 0)),    # w1
                pl.BlockSpec((hidden, hidden), lambda i: (0, 0)),       # w2
                pl.BlockSpec((hidden, latent_dim), lambda i: (0, 0)),   # w3
                pl.BlockSpec((8, PACK_W), lambda i: (0, 0)),            # packed params
            ],
            out_specs=pl.BlockSpec((block_b, latent_dim), lambda i: (i, 0)),
        ),
        compiler_params=pltpu.CompilerParams(
            dimension_semantics=("parallel",),
            vmem_limit_bytes=32 << 20),
    )(x, prepared["w1"], prepared["w2"], prepared["w3"], prepared["packed"])

    return out


def init_params(key, input_dim, latent_dim=32, hidden=64):
    """Xavier-uniform weights, zero biases (matches _init_weights).
    Weights stored as [in, out] (transposed vs. PyTorch's [out, in])."""
    def xavier(k, fan_in, fan_out):
        bound = jnp.sqrt(6.0 / (fan_in + fan_out))
        return jax.random.uniform(k, (fan_in, fan_out), jnp.float32, -bound, bound)

    k1, k2, k3 = jax.random.split(key, 3)
    return {
        "w1": xavier(k1, input_dim, hidden),
        "b1": jnp.zeros((hidden,), jnp.float32),
        "g1": jnp.ones((hidden,), jnp.float32),    # LayerNorm weight (default 1)
        "be1": jnp.zeros((hidden,), jnp.float32),  # LayerNorm bias   (default 0)
        "w2": xavier(k2, hidden, hidden),
        "b2": jnp.zeros((hidden,), jnp.float32),
        "g2": jnp.ones((hidden,), jnp.float32),
        "be2": jnp.zeros((hidden,), jnp.float32),
        "w3": xavier(k3, hidden, latent_dim),
        "b3": jnp.zeros((latent_dim,), jnp.float32),
    }


def reference_forward(state, params, matmul_dtype=jnp.float32):
    """Pure-JAX reference matching the PyTorch module (two-pass LayerNorm).
    matmul_dtype=bfloat16 mirrors the kernel's MXU operand rounding."""
    def mm(a, w):
        return jnp.dot(a.astype(matmul_dtype), jnp.asarray(w, matmul_dtype),
                       preferred_element_type=jnp.float32)

    def ln(x, g, b):
        m = jnp.mean(x, axis=-1, keepdims=True)
        v = jnp.mean(jnp.square(x - m), axis=-1, keepdims=True)
        return (x - m) / jnp.sqrt(v + LN_EPS) * g + b

    h = jnp.maximum(mm(state, params["w1"]) + params["b1"], 0.0)
    h = ln(h, params["g1"], params["be1"])
    h = jnp.maximum(mm(h, params["w2"]) + params["b2"], 0.0)
    h = ln(h, params["g2"], params["be2"])
    return jnp.tanh(mm(h, params["w3"]) + params["b3"])


if __name__ == "__main__":
    key = jax.random.PRNGKey(0)
    k_param, k_state = jax.random.split(key)

    batch, input_dim, latent_dim = 8, 32, 32   # AgentConfig.latent_dim = 32
    params = init_params(k_param, input_dim, latent_dim)
    prepared = prepare_params(params)          # one-time param prep
    state = jax.random.normal(k_state, (batch, input_dim), jnp.float32)

    out = jax.block_until_ready(communication_encoder(state, prepared))
    assert out.shape == (batch, latent_dim), out.shape

    ref_bf16 = reference_forward(state, params, jnp.bfloat16)  # same MXU numerics
    ref_f32 = reference_forward(state, params, jnp.float32)    # strict spec ref
    assert jnp.allclose(out, ref_bf16, atol=2e-3, rtol=2e-3), float(
        jnp.max(jnp.abs(out - ref_bf16)))
    assert jnp.allclose(out, ref_f32, atol=3e-2, rtol=0.0), float(
        jnp.max(jnp.abs(out - ref_f32)))

    # Ragged batch: exercises the cdiv grid + masked writeback of the last block.
    state2 = jax.random.normal(jax.random.PRNGKey(1), (13, input_dim), jnp.float32)
    out2 = jax.block_until_ready(
        communication_encoder(state2, prepared, block_b=8))
    assert out2.shape == (13, latent_dim), out2.shape
    ref2 = reference_forward(state2, params, jnp.bfloat16)
    assert jnp.allclose(out2, ref2, atol=2e-3, rtol=2e-3), float(
        jnp.max(jnp.abs(out2 - ref2)))

    print("KERNEL_OK")
</pallas_src>

<mosaic_0001>
module attributes {stable_mosaic.version = 11 : i64} {
  func.func @comm_encoder_kernel(%arg0: i32, %arg1: memref<8x32xbf16, #tpu.memory_space<vmem>>, %arg2: memref<32x64xbf16, #tpu.memory_space<vmem>>, %arg3: memref<64x64xbf16, #tpu.memory_space<vmem>>, %arg4: memref<64x32xbf16, #tpu.memory_space<vmem>>, %arg5: memref<8x128xf32, #tpu.memory_space<vmem>>, %arg6: memref<8x32xf32, #tpu.memory_space<vmem>>) attributes {dimension_semantics = [#tpu.dimension_semantics<parallel>], iteration_bounds = array<i64: 1>, scalar_prefetch = 0 : i64, scratch_operands = 0 : i64, tpu.core_type = #tpu.core_type<tc>, window_params = [{transform_indices = @transform_0, window_bounds = array<i64: 8, 32>}, {pipeline_mode = #tpu.pipeline_mode<synchronous>, transform_indices = @transform_1, window_bounds = array<i64: 32, 64>}, {pipeline_mode = #tpu.pipeline_mode<synchronous>, transform_indices = @transform_2, window_bounds = array<i64: 64, 64>}, {pipeline_mode = #tpu.pipeline_mode<synchronous>, transform_indices = @transform_3, window_bounds = array<i64: 64, 32>}, {pipeline_mode = #tpu.pipeline_mode<synchronous>, transform_indices = @transform_4, window_bounds = array<i64: 8, 128>}, {transform_indices = @transform_5, window_bounds = array<i64: 8, 32>}]} {
    %c0 = arith.constant 0 : index
    %c0_0 = arith.constant 0 : index
    %0 = vector.load %arg1[%c0, %c0_0] : memref<8x32xbf16, #tpu.memory_space<vmem>>, vector<8x32xbf16>
    %c0_1 = arith.constant 0 : index
    %c0_2 = arith.constant 0 : index
    %1 = vector.load %arg5[%c0_1, %c0_2] : memref<8x128xf32, #tpu.memory_space<vmem>>, vector<8x128xf32>
    %2 = vector.extract_strided_slice %1 {offsets = [0, 0], sizes = [1, 64], strides = [1, 1]} : vector<8x128xf32> to vector<1x64xf32>
    %3 = vector.extract_strided_slice %1 {offsets = [1, 0], sizes = [1, 64], strides = [1, 1]} : vector<8x128xf32> to vector<1x64xf32>
    %4 = vector.extract_strided_slice %1 {offsets = [2, 0], sizes = [1, 64], strides = [1, 1]} : vector<8x128xf32> to vector<1x64xf32>
    %5 = vector.extract_strided_slice %1 {offsets = [3, 0], sizes = [1, 64], strides = [1, 1]} : vector<8x128xf32> to vector<1x64xf32>
    %6 = vector.extract_strided_slice %1 {offsets = [4, 0], sizes = [1, 64], strides = [1, 1]} : vector<8x128xf32> to vector<1x64xf32>
    %7 = vector.extract_strided_slice %1 {offsets = [5, 0], sizes = [1, 64], strides = [1, 1]} : vector<8x128xf32> to vector<1x64xf32>
    %8 = vector.extract_strided_slice %1 {offsets = [6, 0], sizes = [1, 32], strides = [1, 1]} : vector<8x128xf32> to vector<1x32xf32>
    %c0_3 = arith.constant 0 : index
    %c0_4 = arith.constant 0 : index
    %9 = vector.load %arg2[%c0_3, %c0_4] : memref<32x64xbf16, #tpu.memory_space<vmem>>, vector<32x64xbf16>
    %cst = arith.constant dense<0.000000e+00> : vector<8x64xf32>
    %10 = tpu.matmul %0, %9, %cst {dimension_numbers = #tpu.dot_dimension_numbers<[1], [0], [0], [1], [0, 0, 1, 1], [], []>} : vector<8x32xbf16>, vector<32x64xbf16>, vector<8x64xf32> -> vector<8x64xf32>
    %11 = vector.broadcast %2 : vector<1x64xf32> to vector<8x64xf32>
    %12 = arith.addf %10, %11 : vector<8x64xf32>
    %cst_5 = arith.constant 0.000000e+00 : f32
    %13 = vector.broadcast %cst_5 : f32 to vector<8x64xf32>
    %14 = arith.maximumf %12, %13 : vector<8x64xf32>
    %cst_6 = arith.constant dense<0.000000e+00> : vector<8xf32>
    %15 = vector.multi_reduction <add>, %14, %cst_6 [1] : vector<8x64xf32> to vector<8xf32>
    %16 = vector.shape_cast %15 : vector<8xf32> to vector<8x1xf32>
    %17 = arith.mulf %14, %14 : vector<8x64xf32>
    %cst_7 = arith.constant dense<0.000000e+00> : vector<8xf32>
    %18 = vector.multi_reduction <add>, %17, %cst_7 [1] : vector<8x64xf32> to vector<8xf32>
    %19 = vector.shape_cast %18 : vector<8xf32> to vector<8x1xf32>
    %cst_8 = arith.constant 1.562500e-02 : f32
    %20 = vector.broadcast %cst_8 : f32 to vector<8x1xf32>
    %21 = arith.mulf %16, %20 : vector<8x1xf32>
    %cst_9 = arith.constant 1.562500e-02 : f32
    %22 = vector.broadcast %cst_9 : f32 to vector<8x1xf32>
    %23 = arith.mulf %19, %22 : vector<8x1xf32>
    %24 = arith.mulf %21, %21 : vector<8x1xf32>
    %25 = arith.subf %23, %24 : vector<8x1xf32>
    %cst_10 = arith.constant 0.000000e+00 : f32
    %26 = vector.broadcast %cst_10 : f32 to vector<8x1xf32>
    %27 = arith.maximumf %25, %26 : vector<8x1xf32>
    %28 = vector.broadcast %21 : vector<8x1xf32> to vector<8x64xf32>
    %29 = arith.subf %14, %28 : vector<8x64xf32>
    %cst_11 = arith.constant 9.99999974E-6 : f32
    %30 = vector.broadcast %cst_11 : f32 to vector<8x1xf32>
    %31 = arith.addf %27, %30 : vector<8x1xf32>
    %32 = math.rsqrt %31 : vector<8x1xf32>
    %33 = vector.broadcast %32 : vector<8x1xf32> to vector<8x64xf32>
    %34 = arith.mulf %29, %33 : vector<8x64xf32>
    %35 = vector.broadcast %3 : vector<1x64xf32> to vector<8x64xf32>
    %36 = arith.mulf %34, %35 : vector<8x64xf32>
    %37 = vector.broadcast %4 : vector<1x64xf32> to vector<8x64xf32>
    %38 = arith.addf %36, %37 : vector<8x64xf32>
    %39 = arith.truncf %38 : vector<8x64xf32> to vector<8x64xbf16>
    %c0_12 = arith.constant 0 : index
    %c0_13 = arith.constant 0 : index
    %40 = vector.load %arg3[%c0_12, %c0_13] : memref<64x64xbf16, #tpu.memory_space<vmem>>, vector<64x64xbf16>
    %cst_14 = arith.constant dense<0.000000e+00> : vector<8x64xf32>
    %41 = tpu.matmul %39, %40, %cst_14 {dimension_numbers = #tpu.dot_dimension_numbers<[1], [0], [0], [1], [0, 0, 1, 1], [], []>} : vector<8x64xbf16>, vector<64x64xbf16>, vector<8x64xf32> -> vector<8x64xf32>
    %42 = vector.broadcast %5 : vector<1x64xf32> to vector<8x64xf32>
    %43 = arith.addf %41, %42 : vector<8x64xf32>
    %cst_15 = arith.constant 0.000000e+00 : f32
    %44 = vector.broadcast %cst_15 : f32 to vector<8x64xf32>
    %45 = arith.maximumf %43, %44 : vector<8x64xf32>
    %cst_16 = arith.constant dense<0.000000e+00> : vector<8xf32>
    %46 = vector.multi_reduction <add>, %45, %cst_16 [1] : vector<8x64xf32> to vector<8xf32>
    %47 = vector.shape_cast %46 : vector<8xf32> to vector<8x1xf32>
    %48 = arith.mulf %45, %45 : vector<8x64xf32>
    %cst_17 = arith.constant dense<0.000000e+00> : vector<8xf32>
    %49 = vector.multi_reduction <add>, %48, %cst_17 [1] : vector<8x64xf32> to vector<8xf32>
    %50 = vector.shape_cast %49 : vector<8xf32> to vector<8x1xf32>
    %cst_18 = arith.constant 1.562500e-02 : f32
    %51 = vector.broadcast %cst_18 : f32 to vector<8x1xf32>
    %52 = arith.mulf %47, %51 : vector<8x1xf32>
    %cst_19 = arith.constant 1.562500e-02 : f32
    %53 = vector.broadcast %cst_19 : f32 to vector<8x1xf32>
    %54 = arith.mulf %50, %53 : vector<8x1xf32>
    %55 = arith.mulf %52, %52 : vector<8x1xf32>
    %56 = arith.subf %54, %55 : vector<8x1xf32>
    %cst_20 = arith.constant 0.000000e+00 : f32
    %57 = vector.broadcast %cst_20 : f32 to vector<8x1xf32>
    %58 = arith.maximumf %56, %57 : vector<8x1xf32>
    %59 = vector.broadcast %52 : vector<8x1xf32> to vector<8x64xf32>
    %60 = arith.subf %45, %59 : vector<8x64xf32>
    %cst_21 = arith.constant 9.99999974E-6 : f32
    %61 = vector.broadcast %cst_21 : f32 to vector<8x1xf32>
    %62 = arith.addf %58, %61 : vector<8x1xf32>
    %63 = math.rsqrt %62 : vector<8x1xf32>
    %64 = vector.broadcast %63 : vector<8x1xf32> to vector<8x64xf32>
    %65 = arith.mulf %60, %64 : vector<8x64xf32>
    %66 = vector.broadcast %6 : vector<1x64xf32> to vector<8x64xf32>
    %67 = arith.mulf %65, %66 : vector<8x64xf32>
    %68 = vector.broadcast %7 : vector<1x64xf32> to vector<8x64xf32>
    %69 = arith.addf %67, %68 : vector<8x64xf32>
    %70 = arith.truncf %69 : vector<8x64xf32> to vector<8x64xbf16>
    %c0_22 = arith.constant 0 : index
    %c0_23 = arith.constant 0 : index
    %71 = vector.load %arg4[%c0_22, %c0_23] : memref<64x32xbf16, #tpu.memory_space<vmem>>, vector<64x32xbf16>
    %cst_24 = arith.constant dense<0.000000e+00> : vector<8x32xf32>
    %72 = tpu.matmul %70, %71, %cst_24 {dimension_numbers = #tpu.dot_dimension_numbers<[1], [0], [0], [1], [0, 0, 1, 1], [], []>} : vector<8x64xbf16>, vector<64x32xbf16>, vector<8x32xf32> -> vector<8x32xf32>
    %73 = vector.broadcast %8 : vector<1x32xf32> to vector<8x32xf32>
    %74 = arith.addf %72, %73 : vector<8x32xf32>
    %75 = math.tanh %74 : vector<8x32xf32>
    %c0_25 = arith.constant 0 : index
    %c0_26 = arith.constant 0 : index
    %76 = vector.load %arg6[%c0_25, %c0_26] : memref<8x32xf32, #tpu.memory_space<vmem>>, vector<8x32xf32>
    tpu.vector_store %arg6[%c0_25, %c0_26], %75 {strides = array<i32>} : memref<8x32xf32, #tpu.memory_space<vmem>>, vector<8x32xf32>,
    return
  }
  func.func @transform_0(%arg0: i32) -> (i32, i32) {
    %c0_i32 = arith.constant 0 : i32
    %c0_i32_0 = arith.constant 0 : i32
    return %arg0, %c0_i32 : i32, i32
  }
  func.func @transform_1(%arg0: i32) -> (i32, i32) {
    %c0_i32 = arith.constant 0 : i32
    %c0_i32_0 = arith.constant 0 : i32
    %c0_i32_1 = arith.constant 0 : i32
    return %c0_i32, %c0_i32_0 : i32, i32
  }
  func.func @transform_2(%arg0: i32) -> (i32, i32) {
    %c0_i32 = arith.constant 0 : i32
    %c0_i32_0 = arith.constant 0 : i32
    %c0_i32_1 = arith.constant 0 : i32
    return %c0_i32, %c0_i32_0 : i32, i32
  }
  func.func @transform_3(%arg0: i32) -> (i32, i32) {
    %c0_i32 = arith.constant 0 : i32
    %c0_i32_0 = arith.constant 0 : i32
    %c0_i32_1 = arith.constant 0 : i32
    return %c0_i32, %c0_i32_0 : i32, i32
  }
  func.func @transform_4(%arg0: i32) -> (i32, i32) {
    %c0_i32 = arith.constant 0 : i32
    %c0_i32_0 = arith.constant 0 : i32
    %c0_i32_1 = arith.constant 0 : i32
    return %c0_i32, %c0_i32_0 : i32, i32
  }
  func.func @transform_5(%arg0: i32) -> (i32, i32) {
    %c0_i32 = arith.constant 0 : i32
    %c0_i32_0 = arith.constant 0 : i32
    return %arg0, %c0_i32 : i32, i32
  }
}

</mosaic_0001>

<bundles_post_ra>
// kernel: communication_encoder.1
= control target key start
LH: loop header
LB: loop body
LE: loop exit
PB: predicated region body
PF: predicated region fallthrough
CT: control target
= control target key end

     0   :  { %10 = vsyncpa [#allocation3], 0  ;;  %s566_s0 = inlined_call_operand.vmem [shape: bf16[8,32], index: 0, kind: input, shape index: {}]   ;;  %s567_s1 = inlined_call_operand.vmem [shape: bf16[32,64], index: 1, kind: input, shape index: {}]   ;;  %s568_s2 = inlined_call_operand.vmem [shape: bf16[64,64], index: 2, kind: input, shape index: {}]   ;;  %s569_s3 = inlined_call_operand.vmem [shape: bf16[64,32], index: 3, kind: input, shape index: {}]   ;;  %s570_s4 = inlined_call_operand.hbm [shape: f32[8,128], index: 4, kind: input, shape index: {}]   ;;  %s571_s5 = inlined_call_operand.hbm [shape: f32[8,32], index: 5, kind: output, shape index: {}]  }
   0x1   :  { %11 = vsyncpa [#allocation4], 0  ;;  %s454_s18 = smov [#allocation2]  }
   0x2   :  { %s26_s19 = sshll.u32 %s454_s18, 4  ;;  %s27_s19 = int_to_ptr.vmem [resolvable:$true] %s26_s19 }
   0x3   :  { %s418_s20 = scalar_lea.vmem %s27_s19, 128  ;;  %p423_p1 = scmp.lt.s32.totalorder %s27_s19, %s27_s19 }
   0x4   :  { %p419_p0 = scmp.ne.s32.totalorder %s27_s19, %s418_s20  ;;  %p424_p2 = scmp.lt.s32.totalorder %s418_s20, %s418_s20 }
   0x6   :  { %p425_p3 = por %p424_p2, %p423_p1 }
   0x8   :  { %p426_p4 = pnand %p425_p3, %p419_p0 }
   0xa   :  { %429 = shalt.err (!%p426_p4)
}
   0xb   :  { %29 = dma.hbm_to_vmem [thread:$0]  %s570_s4, 128, %s27_s19, [#allocation3]  }
   0xc   :  { %450 = dma.done.wait [#allocation3], 128  }
   0xd   :  { %451 = vsyncadd [#allocation3], 4294967168  ;;  %v455_v0 = vmov 0.0   ;;  %vm456_vm0 = vmmov 0   ;;  %v394_v1 = vld [vmem:[%s567_s1 + $0x8] sm:$0xff]   ;;  %v395_v2 = vld [vmem:[%s567_s1] sm:$0xff]   ;;  %v40_v4 = vlaneseq }
   0xe   :  { %358 = vmatprep.subr.bf16.mxu0 %v455_v0  ;;  %362 = vmatprep.mubr.msk.bf16.mxu0 %vm456_vm0, %v455_v0  ;;  %vm56_vm1 = vcmask 261120   ;;  %v34_v3 = vld [vmem:[%s566_s0] sm:$0xf]  ;;  %v511_v7 = vld [vmem:[#allocation2] sm:$0xff]  ;;  %vm101_vm2 = vcmask 523264   ;;  %v396_v18 = vld [vmem:[%s568_s2 + $0x18] sm:$0xff]  }
   0xf   :  { %366 = vmatprep.subr.bf16.mxu1 %v455_v0  ;;  %374 = vmatprep.mubr.msk.bf16.mxu1 %vm456_vm0, %v455_v0  ;;  %v508_v5 = vshrl.u32 %v40_v4, 7  ;;  %v397_v19 = vld [vmem:[%s568_s2 + $0x10] sm:$0xff]   ;;  %v398_v20 = vld [vmem:[%s568_s2 + $0x8] sm:$0xff]   ;;  %v399_v21 = vld [vmem:[%s568_s2] sm:$0xff]  }
  0x10   :  { %359 = vmatpush3.bf16.msra.mxu0 %v394_v1  ;;  %367 = vmatpush3.bf16.msra.mxu1 %v396_v18  ;;  %v400_v51 = vld [vmem:[%s569_s3 + $0x18] sm:$0xff]   ;;  %v401_v52 = vld [vmem:[%s569_s3 + $0x10] sm:$0xff]   ;;  %v402_v53 = vld [vmem:[%s569_s3 + $0x8] sm:$0xff]  }
  0x11   :  { %360 = vmatprep.subr.bf16.mxu0 %v455_v0  ;;  %v42_v6 = vsub.s32 0, %v508_v5  ;;  %368 = vmatprep.subr.bf16.mxu1 %v455_v0  ;;  %v120_v30 = vsub.s32 1, %v508_v5  ;;  %v125_v31 = vsub.s32 2, %v508_v5  ;;  %v139_v40 = vsub.s32 3, %v508_v5  ;;  %v403_v54 = vld [vmem:[%s569_s3] sm:$0xff]   ;;  %s457_s3 = smov [#allocation5]  }
  0x12   :  { %v227_v63 = vsub.s32 4, %v508_v5  ;;  %v232_v1 = vsub.s32 5, %v508_v5  ;;  %s323_s16 = sshll.u32 %s457_s3, 4  ;;  %s324_s16 = int_to_ptr.vmem [resolvable:$true] %s323_s16 }
  0x13   :  { %v43_v8 = vrot.slane %v511_v7, %v42_v6  ;;  %v121_v33 = vrot.slane %v511_v7, %v120_v30  ;;  %v126_v36 = vrot.slane %v511_v7, %v125_v31  ;;  %v140_v41 = vrot.slane %v511_v7, %v139_v40  ;;  %s430_s17 = scalar_lea.vmem %s324_s16, 128  ;;  %p435_p6 = scmp.lt.s32.totalorder %s324_s16, %s324_s16 }
  0x14   :  { %361 = vmatpush3.bf16.msra.mxu0 %v395_v2  ;;  %369 = vmatpush3.bf16.msra.mxu1 %v397_v19  ;;  %p431_p5 = scmp.ne.s32.totalorder %s324_s16, %s430_s17  ;;  %p436_p7 = scmp.lt.s32.totalorder %s430_s17, %s430_s17 }
  0x15   :  { %378 = vmatprep.subr.bf16.mxu0 %v455_v0  ;;  %370 = vmatprep.subr.bf16.mxu1 %v455_v0 }
  0x16   :  { %p437_p8 = por %p436_p7, %p435_p6 }
  0x17   :  { %363 = vmatmul.mubr.msk.bf16.vlgmr.msra.gmra.mxu0 %vm56_vm1, %v34_v3  ;;  %v228_v3 = vrot.slane %v511_v7, %v227_v63 }
  0x18   :  { %386 = vmatprep.mubr.msk.bf16.mxu0 %vm456_vm0, %v455_v0  ;;  %371 = vmatpush3.bf16.msra.mxu1 %v398_v20  ;;  %p438_p9 = pnand %p437_p8, %p431_p5 }
  0x19   :  { %372 = vmatprep.subr.bf16.mxu1 %v455_v0  ;;  %379 = vmatpush3.bf16.msra.mxu0 %v400_v51 }
  0x1a   :  { %380 = vmatprep.subr.bf16.mxu0 %v455_v0 }
  0x1c   :  { %373 = vmatpush3.bf16.msra.mxu1 %v399_v21 }
  0x1d   :  { %381 = vmatpush3.bf16.msra.mxu0 %v401_v52 }
  0x1e   :  { %382 = vmatprep.subr.bf16.mxu0 %v455_v0 }
  0x21   :  { %383 = vmatpush3.bf16.msra.mxu0 %v402_v53 }
  0x22   :  { %384 = vmatprep.subr.bf16.mxu0 %v455_v0  ;;  %v233_v0 = vrot.slane %v511_v7, %v232_v1 }
  0x25   :  { %385 = vmatpush3.bf16.msra.mxu0 %v403_v54 }
  0xd7   :  { %v94_v9 = vpop.f32.mrf.mxu0 }
  0xd8   :  { %v95_v10 = vadd.f32 %v94_v9, %v43_v8 }
  0xd9   :  { %v364_v11 = vpop.f32.mrf.mxu0 }
  0xda   :  { %v100_v12 = vmax.f32 %v95_v10, 0.0  ;;  %v246_v11 = vsub.s32 6, %v508_v5 }
  0xdb   :  { %v97_v13 = vpop.f32.mrf.mxu0 }
  0xdc   :  { %v102_v14 = vsel %vm101_vm2, %v100_v12, 0.0  ;;  %v105_v15 = vmul.f32 %v100_v12, %v100_v12 }
  0xdd   :  { %103 = vadd.xlane.f32.xlu0 %v102_v14  ;;  %v365_v16 = vpop.f32.mrf.mxu0 }
  0xde   :  { %v106_v17 = vsel %vm101_vm2, %v105_v15, 0.0 }
  0xe1   :  { %107 = vadd.xlane.f32.xlu0 %v106_v17 }
 0x166   :  { %v104_v22 = vpop.xlane.xlu0 %103 }
 0x167   :  { %v109_v23 = vmul.f32 0.015625, %v104_v22 }
 0x169   :  { %v111_v25 = vmul.f32 %v109_v23, %v109_v23  ;;  %v114_v32 = vsub.f32 %v100_v12, %v109_v23  ;;  %v247_v12 = vrot.slane %v511_v7, %v246_v11 }
 0x16a   :  { %v108_v24 = vpop.xlane.xlu0 %107 }
 0x16b   :  { %v110_v26 = vmul.f32 0.015625, %v108_v24 }
 0x16d   :  { %v112_v27 = vsub.f32 %v110_v26, %v111_v25 }
 0x16f   :  { %v113_v28 = vmax.f32 %v112_v27, 0.0 }
 0x171   :  { %v115_v29 = vadd.f32 1e-05, %v113_v28 }
 0x173   :  { %404 = vrsqrt.f32 %v115_v29 }
 0x180   :  { %v405_v34 = vpop.eup %404 }
 0x181   :  { %v117_v35 = vmul.f32 %v405_v34, %v114_v32 }
 0x183   :  { %v122_v37 = vmul.f32 %v121_v33, %v117_v35 }
 0x185   :  { %v127_v38 = vadd.f32 %v126_v36, %v122_v37 }
 0x187   :  { %v128_v39 = vpack.c.bf16 %v127_v38, %v127_v38 }
 0x189   :  { %375 = vmatmul.mubr.msk.bf16.vlgmr.msra.gmra.mxu1 %vm101_vm2, %v128_v39 }
 0x249   :  { %v202_v42 = vpop.f32.mrf.mxu1 }
 0x24a   :  { %v203_v43 = vadd.f32 %v202_v42, %v140_v41 }
 0x24b   :  { %v376_v44 = vpop.f32.mrf.mxu1 }
 0x24c   :  { %v208_v45 = vmax.f32 %v203_v43, 0.0 }
 0x24d   :  { %v205_v46 = vpop.f32.mrf.mxu1 }
 0x24e   :  { %v209_v47 = vsel %vm101_vm2, %v208_v45, 0.0  ;;  %v212_v48 = vmul.f32 %v208_v45, %v208_v45 }
 0x24f   :  { %210 = vadd.xlane.f32.xlu1 %v209_v47  ;;  %v377_v49 = vpop.f32.mrf.mxu1 }
 0x250   :  { %v213_v50 = vsel %vm101_vm2, %v212_v48, 0.0 }
 0x253   :  { %214 = vadd.xlane.f32.xlu1 %v213_v50 }
 0x2d8   :  { %v211_v55 = vpop.xlane.xlu1 %210 }
 0x2d9   :  { %v216_v56 = vmul.f32 0.015625, %v211_v55 }
 0x2db   :  { %v218_v58 = vmul.f32 %v216_v56, %v216_v56  ;;  %v221_v2 = vsub.f32 %v208_v45, %v216_v56 }
 0x2dc   :  { %v215_v57 = vpop.xlane.xlu1 %214 }
 0x2dd   :  { %v217_v59 = vmul.f32 0.015625, %v215_v57 }
 0x2df   :  { %v219_v60 = vsub.f32 %v217_v59, %v218_v58 }
 0x2e1   :  { %v220_v61 = vmax.f32 %v219_v60, 0.0 }
 0x2e3   :  { %v222_v62 = vadd.f32 1e-05, %v220_v61 }
 0x2e5   :  { %406 = vrsqrt.f32 %v222_v62 }
 0x2f2   :  { %v407_v4 = vpop.eup %406 }
 0x2f3   :  { %v224_v6 = vmul.f32 %v407_v4, %v221_v2 }
 0x2f5   :  { %v229_v8 = vmul.f32 %v228_v3, %v224_v6 }
 0x2f7   :  { %v234_v9 = vadd.f32 %v233_v0, %v229_v8 }
 0x2f9   :  { %v235_v10 = vpack.c.bf16 %v234_v9, %v234_v9 }
 0x2fb   :  { %387 = vmatmul.mubr.msk.bf16.vlgmr.msra.gmra.mxu0 %vm101_vm2, %v235_v10 }
 0x3bb   :  { %v309_v13 = vpop.f32.mrf.mxu0 }
 0x3bc   :  { %v310_v14 = vadd.f32 %v309_v13, %v247_v12 }
 0x3bd   :  { %v388_v15 = vpop.f32.mrf.mxu0 }
 0x3be   :  { %408 = vtanh.f32 %v310_v14 }
 0x3bf   :  { %v312_v16 = vpop.f32.mrf.mxu0 }
 0x3c1   :  { %v389_v17 = vpop.f32.mrf.mxu0 }
 0x3cb   :  { %v409_v18 = vpop.eup %408 }
 0x3cc   :  { %316 = vst.msk [vmem:[#allocation5] sm:$0xff] %vm56_vm1, %v409_v18 }
 0x3cd   :  { %441 = shalt.err (!%p438_p9)
}
 0x3ce   :  { %326 = dma.vmem_to_hbm [thread:$0]  %s324_s16, 128, %s571_s5, [#allocation4]  }
 0x3cf   :  { %452 = dma.done.wait [#allocation4], 128  }
 0x3d0   :  { %453 = vsyncadd [#allocation4], 4294967168 }
 0x3d1   :  { %330 = vsyncpa [#allocation3], 1 }
 0x3d2   :  { %331 = vsyncpa [#allocation4], 1 }

</bundles_post_ra>
